<compile_context>
chip_gen: v7x
topology: tpu7x:2x2x1
jax: 0.10.0
libtpu: 0.0.40
codegen_flags: <defaults>
</compile_context>

<pallas_src>
import math

import jax
import jax.numpy as jnp
from jax.experimental import pallas as pl
from jax.experimental.pallas import tpu as pltpu


# -----------------------------------------------------------------------------
# Rotation table (mirrors RotaryQueryKeyPE.__init__).
#   ct[..., 2k] = cos(angle_k),  ct[..., 2k+1] = sin(angle_k)
# i.e. exactly torch.view_as_real(rotations).flatten(-2).  Built once at init.
# -----------------------------------------------------------------------------
def make_rotation_table(dim, grid_size, base=10000.0, dtype=jnp.float32):
    k_max = dim // (2 * len(grid_size))
    assert dim % k_max == 0 and k_max > 1, (
        f"dim ({dim}) not divisible by 2 * len(grid_size) (={2 * len(grid_size)})")
    theta_ks = 1.0 / (base ** (jnp.arange(k_max, dtype=jnp.float32) / k_max))
    mesh = jnp.meshgrid(
        *[jnp.arange(d, dtype=jnp.float32) for d in grid_size], indexing="ij")
    angles = jnp.concatenate([m[..., None] * theta_ks for m in mesh], axis=-1)
    ct = jnp.stack([jnp.cos(angles), jnp.sin(angles)], axis=-1)  # (*gs, dim//2, 2)
    return ct.reshape(*angles.shape[:-1], dim).astype(dtype)     # interleaved (c,s,...)


# -----------------------------------------------------------------------------
# Kernel: out = complex rotation applied to interleaved (real, imag) lanes.
# -----------------------------------------------------------------------------
def _rope_kernel(ct_ref, x_ref, o_ref):
    x = x_ref[...].astype(jnp.float32)       # (rt, cols): [xr0, xi0, xr1, xi1, ...]
    ct = ct_ref[...].astype(jnp.float32)     # (rt, cols): [ c0,  s0,  c1,  s1, ...]
    cols = x.shape[-1]

    # Adjacent even/odd lane swap: two XLU rotates + a parity select (VPU).
    # pltpu.roll has np.roll semantics: out[i] = in[(i - shift) % n].
    x_next = pltpu.roll(x, cols - 1, 1)      # lane i <- x[i + 1]
    x_prev = pltpu.roll(x, 1, 1)             # lane i <- x[i - 1]
    ct_next = pltpu.roll(ct, cols - 1, 1)
    ct_prev = pltpu.roll(ct, 1, 1)

    lane = jax.lax.broadcasted_iota(jnp.int32, x.shape, 1)
    even = (lane & 1) == 0
    x_pair = jnp.where(even, x_next, x_prev)       # [xi0, xr0, xi1, xr1, ...]
    ct_pair = jnp.where(even, ct_next, ct_prev)    # [ s0,  c0,  s1,  c1, ...]

    # even lanes: xr*c - xi*s        odd lanes: xi*c + xr*s
    o_ref[...] = jnp.where(
        even,
        x * ct - x_pair * ct_pair,
        x * ct_pair + x_pair * ct,
    ).astype(o_ref.dtype)


# -----------------------------------------------------------------------------
# Layout picker (lane-dense in every reachable path).
# -----------------------------------------------------------------------------
def _largest_divisor(n, *, multiple_of, limit):
    """Largest divisor of n that is a multiple of `multiple_of` and <= limit."""
    best = None
    d = multiple_of
    limit = min(limit, n)
    while d <= limit:
        if n % d == 0:
            best = d
        d += multiple_of
    return best


def _pick_layout(total, last_dim, itemsize, target_bytes):
    """Factor the per-batch element count into a lane-dense (rows, cols) view.

    cols: a multiple-of-128 divisor of `total` (unmasked full-width stores);
    rt:   multiple-of-8 row tile within the block budget, capped at rows//2 so
          the row axis gets >= 2 grid steps whenever possible (v7x 2 TCs).
    """
    cands = [c for c in range(128, min(total, 8192) + 1, 128) if total % c == 0]
    cols = None
    for pred in (lambda r: r % 8 == 0 and r >= 16,   # >= 2 full-sublane row tiles
                 lambda r: r % 8 == 0,               # full-sublane row tiles
                 lambda r: True):                    # lane-dense, awkward row count
        ok = [c for c in cands if pred(total // c)]
        if ok:
            cols = max(ok)
            break
    if cols is None:
        # No multiple-of-128 factorization of the per-batch slab.
        # TODO(synk): pad the flattened slab to a multiple of 128 lanes instead
        # of this lane-sparse (masked-store) fallback.
        cols = last_dim
    rows = total // cols
    assert cols % 2 == 0, "(real, imag) pairs must not straddle rows"

    max_rows = max(1, target_bytes // (cols * itemsize))
    if rows % 8 == 0 and rows >= 8:
        limit = min(max_rows, rows // 2) if rows >= 16 else min(max_rows, rows)
        rt = _largest_divisor(rows, multiple_of=8, limit=limit) or 8
    else:
        # Block must span the full (non multiple-of-8) row axis to keep the
        # (8, 128) block-shape rule satisfied.
        rt = rows
    return rows, cols, rt


# -----------------------------------------------------------------------------
# Wrapper
# -----------------------------------------------------------------------------
def rotary_qk_pe(x, ct, *, target_block_bytes=2 << 20):
    """Pallas forward of RotaryQueryKeyPE.

    x:  (B, *grid_size, dim); last dim is interleaved (real, imag) pairs.
    ct: (*grid_size, dim) interleaved rotation table from make_rotation_table.
    """
    B = x.shape[0]
    total = math.prod(x.shape[1:])             # N * dim
    assert math.prod(ct.shape) == total, "rotation table does not match x"

    rows, cols, rt = _pick_layout(total, x.shape[-1], 4, target_block_bytes)

    # Contiguous (free) reshapes into lane-dense per-batch 2D slabs.
    x3 = x.reshape(B, rows, cols)
    ct2 = ct.reshape(rows, cols)

    x_spec = pl.BlockSpec((None, rt, cols), lambda r, b: (b, r, 0))
    # Table index_map ignores b; with b innermost the table block index is
    # unchanged across the batch loop -> fetched once per row tile.
    t_spec = pl.BlockSpec((rt, cols), lambda r, b: (r, 0))

    out = pl.pallas_call(
        _rope_kernel,
        out_shape=jax.ShapeDtypeStruct((B, rows, cols), x.dtype),
        grid=(rows // rt, B),                  # batch innermost
        in_specs=[t_spec, x_spec],
        out_specs=x_spec,
        compiler_params=pltpu.CompilerParams(
            dimension_semantics=("parallel", "parallel"),
            vmem_limit_bytes=48 << 20),
    )(ct2, x3)
    return out.reshape(x.shape)


# -----------------------------------------------------------------------------
# Pure-JAX reference (mirrors the torch complex math).
# -----------------------------------------------------------------------------
def rotary_ref(x, ct):
    dh = x.shape[-1] // 2
    xp = x.reshape(*x.shape[:-1], dh, 2).astype(jnp.float32)
    ctp = ct.reshape(*ct.shape[:-1], dh, 2).astype(jnp.float32)
    xr, xi = xp[..., 0], xp[..., 1]
    c, s = ctp[None, ..., 0], ctp[None, ..., 1]
    out = jnp.stack([xr * c - xi * s, xr * s + xi * c], axis=-1)
    return out.reshape(x.shape).astype(x.dtype)


if __name__ == "__main__":
    dim = 32
    grid_size = (16, 16)
    B = 2

    key = jax.random.PRNGKey(0)
    x = jax.random.normal(key, (B, *grid_size, dim), dtype=jnp.float32)

    ct = make_rotation_table(dim, grid_size)        # init-time buffer (f32)

    out = jax.block_until_ready(rotary_qk_pe(x, ct))

    ref = rotary_ref(x, ct)
    assert out.shape == x.shape
    assert jnp.allclose(out, ref, atol=1e-5, rtol=1e-5), "mismatch vs reference"

    print("KERNEL_OK")
</pallas_src>

<mosaic_0001>
module attributes {stable_mosaic.version = 11 : i64} {
  func.func @_rope_kernel(%arg0: i32, %arg1: i32, %arg2: memref<8x512xf32, #tpu.memory_space<vmem>>, %arg3: memref<1x8x512xf32, #tpu.memory_space<vmem>>, %arg4: memref<1x8x512xf32, #tpu.memory_space<vmem>>) attributes {dimension_semantics = [#tpu.dimension_semantics<parallel>, #tpu.dimension_semantics<parallel>], iteration_bounds = array<i64: 2, 2>, scalar_prefetch = 0 : i64, scratch_operands = 0 : i64, tpu.core_type = #tpu.core_type<tc>, window_params = [{transform_indices = @transform_0, window_bounds = array<i64: 8, 512>}, {transform_indices = @transform_1, window_bounds = array<i64: 1, 8, 512>}, {transform_indices = @transform_2, window_bounds = array<i64: 1, 8, 512>}]} {
    %c0 = arith.constant 0 : index
    %c0_0 = arith.constant 0 : index
    %c0_1 = arith.constant 0 : index
    %0 = vector.load %arg3[%c0, %c0_0, %c0_1] : memref<1x8x512xf32, #tpu.memory_space<vmem>>, vector<1x8x512xf32>
    %1 = vector.shape_cast %0 : vector<1x8x512xf32> to vector<8x512xf32>
    %c0_2 = arith.constant 0 : index
    %c0_3 = arith.constant 0 : index
    %2 = vector.load %arg2[%c0_2, %c0_3] : memref<8x512xf32, #tpu.memory_space<vmem>>, vector<8x512xf32>
    %c511_i32 = arith.constant 511 : i32
    %3 = tpu.dynamic_rotate %1 by %c511_i32 dim 1 : vector<8x512xf32>, i32 -> vector<8x512xf32>
    %c1_i32 = arith.constant 1 : i32
    %4 = tpu.dynamic_rotate %1 by %c1_i32 dim 1 : vector<8x512xf32>, i32 -> vector<8x512xf32>
    %c511_i32_4 = arith.constant 511 : i32
    %5 = tpu.dynamic_rotate %2 by %c511_i32_4 dim 1 : vector<8x512xf32>, i32 -> vector<8x512xf32>
    %c1_i32_5 = arith.constant 1 : i32
    %6 = tpu.dynamic_rotate %2 by %c1_i32_5 dim 1 : vector<8x512xf32>, i32 -> vector<8x512xf32>
    %7 = tpu.iota {dimensions = array<i32: 1>} : vector<8x512xi32>
    %c1_i32_6 = arith.constant 1 : i32
    %8 = vector.broadcast %c1_i32_6 : i32 to vector<8x512xi32>
    %9 = arith.andi %7, %8 : vector<8x512xi32>
    %c0_i32 = arith.constant 0 : i32
    %10 = vector.broadcast %c0_i32 : i32 to vector<8x512xi32>
    %11 = arith.cmpi eq, %9, %10 : vector<8x512xi32>
    %12 = arith.select %11, %3, %4 : vector<8x512xi1>, vector<8x512xf32>
    %13 = arith.select %11, %5, %6 : vector<8x512xi1>, vector<8x512xf32>
    %14 = arith.mulf %1, %2 : vector<8x512xf32>
    %15 = arith.mulf %12, %13 : vector<8x512xf32>
    %16 = arith.subf %14, %15 : vector<8x512xf32>
    %17 = arith.mulf %1, %13 : vector<8x512xf32>
    %18 = arith.mulf %12, %2 : vector<8x512xf32>
    %19 = arith.addf %17, %18 : vector<8x512xf32>
    %20 = arith.select %11, %16, %19 : vector<8x512xi1>, vector<8x512xf32>
    %c0_7 = arith.constant 0 : index
    %c0_8 = arith.constant 0 : index
    %c0_9 = arith.constant 0 : index
    %21 = vector.load %arg4[%c0_7, %c0_8, %c0_9] : memref<1x8x512xf32, #tpu.memory_space<vmem>>, vector<1x8x512xf32>
    %22 = vector.shape_cast %21 : vector<1x8x512xf32> to vector<8x512xf32>
    %23 = vector.shape_cast %20 : vector<8x512xf32> to vector<1x8x512xf32>
    tpu.vector_store %arg4[%c0_7, %c0_8, %c0_9], %23 {strides = array<i32>} : memref<1x8x512xf32, #tpu.memory_space<vmem>>, vector<1x8x512xf32>,
    return
  }
  func.func @transform_0(%arg0: i32, %arg1: i32) -> (i32, i32) {
    %c0_i32 = arith.constant 0 : i32
    %c0_i32_0 = arith.constant 0 : i32
    return %arg0, %c0_i32 : i32, i32
  }
  func.func @transform_1(%arg0: i32, %arg1: i32) -> (i32, i32, i32) {
    %c0_i32 = arith.constant 0 : i32
    %c0_i32_0 = arith.constant 0 : i32
    return %arg1, %arg0, %c0_i32 : i32, i32, i32
  }
  func.func @transform_2(%arg0: i32, %arg1: i32) -> (i32, i32, i32) {
    %c0_i32 = arith.constant 0 : i32
    %c0_i32_0 = arith.constant 0 : i32
    return %arg1, %arg0, %c0_i32 : i32, i32, i32
  }
}

</mosaic_0001>

<bundles_post_ra>
// kernel: tpu_custom_call.1
= control target key start
LH: loop header
LB: loop body
LE: loop exit
PB: predicated region body
PF: predicated region fallthrough
CT: control target
= control target key end

     0   :  { %s1183_s0 = inlined_call_operand.hbm [shape: f32[16,512], index: 0, kind: input, shape index: {}]   ;;  %s1184_s1 = inlined_call_operand.hbm [shape: f32[2,16,512], index: 1, kind: input, shape index: {}]   ;;  %s1185_s2 = inlined_call_operand.hbm [shape: f32[2,16,512], index: 2, kind: output, shape index: {}]  }
   0x1   :  { %1198 = sst [smem:[#allocation17_spill]] %s1183_s0 }
   0x2   :  { %1199 = sst [smem:[#allocation18_spill]] %s1185_s2 }
   0x3   :  { %7 = vsyncpa [#allocation3], 0 }
   0x4   :  { %9 = vsyncpa [#allocation3 + $0x1], 0 }
   0x5   :  { %10 = vsyncpa [#allocation6], 0 }
   0x6   :  { %12 = vsyncpa [#allocation6 + $0x1], 0 }
   0x7   :  { %13 = vsyncpa [#allocation4], 0 }
   0x8   :  { %15 = vsyncpa [#allocation4 + $0x1], 0  ;;  %s793_s9 = smov 0   ;;  %s795_s10 = smov 0  }
   0x9   :  { %s797_s11 = smov 0   ;;  %s799_s12 = smov 0  }
   0xa   :  { %s801_s13 = smov 0   ;;  %s803_s14 = smov 0  }
   0xb   :  { %s805_s15 = smov 0   ;;  %s807_s16 = smov 0  }
   0xc   :  { %s809_s17 = smov 0   ;;  %s811_s18 = smov 0  }
   0xd   :  { %s813_s19 = smov 0  }
   0xe LB: > { %1200 = sst [smem:[#allocation11_spill]] %s731_s9  ;;  %s454_s20 = sadd.s32 4294967295, %s771_s19   ;;  %s771_s19 = sphi %s813_s19, %s21_s19   ;;  %s767_s18 = sphi %s811_s18, %s1248_s18   ;;  %s763_s17 = sphi %s809_s17, %s1247_s17   ;;  %s759_s16 = sphi %s807_s16, %s1246_s16   ;;  %s755_s15 = sphi %s805_s15, %s1245_s15   ;;  %s751_s14 = sphi %s803_s14, %s1244_s14   ;;  %s747_s13 = sphi %s801_s13, %s1243_s13   ;;  %s743_s12 = sphi %s799_s12, %s1242_s12   ;;  %s739_s11 = sphi %s797_s11, %s1241_s11   ;;  %s735_s10 = sphi %s795_s10, %s1240_s10   ;;  %s731_s9 = sphi %s793_s9, %s1239_s9  }
   0xf   : > { %1201 = sst [smem:[#allocation12_spill]] %s755_s15  ;;  %s33_s21 = sadd.s32 1, %s767_s18 }
  0x10   : > { %s40_s22 = sadd.s32 1, %s751_s14  ;;  %p47_p0 = scmp.ne.s32.totalorder %s751_s14, %s747_s13 }
  0x11   : > { %p1187_p1 = scmp.eq.s32.totalorder %s771_s19, 0  ;;  %p53_p2 = scmp.ne.s32.totalorder %s747_s13, %s743_s12 }
  0x12   : > { %p855_p3 = scmp.eq.s32.totalorder %s454_s20, 0  ;;  %p1186_p5 = scmp.lt.s32.totalorder %s771_s19, 4 }
  0x13   : > { %p49_p4 = por %p1187_p1, %p47_p0  ;;  %s133_s25 = sand.u32 1, %s751_s14  }
  0x14   : > { %p864_p6 = por %p855_p3, %p53_p2  ;;  %s458_s26 = sshll.u32 %s133_s25, 5 }
  0x15   : > { %s475_s27 = sshll.u32 %s767_s18, 9  ;;  %s1204_s0 = sld [smem:[#allocation17_spill]] }
  0x16   : > { %s1203_s24 = scalar_select %p864_p6, 1, 0 }
  0x17   : > { %s137_s3 = scalar_lea.vmem [#allocation2], %s458_s26  ;;  %p879_p7 = pnand %p1186_p5, %p49_p4 }
  0x18   : > { %s145_s4 = sshll.u32 %s137_s3, 4  ;;  %s134_s6 = scalar_lea.sflag [#allocation3], %s133_s25  ;;  %s875_s4 = int_to_ptr.vmem [resolvable:$true] %s145_s4 }
  0x19   : > { %p587_p11 = pneg %p879_p7 }
  0x1b   : > { %s873_s30 = scalar_lea.hbm %s1204_s0, %s475_s27  ;;  %s590_s26 = scalar_lea.hbm %s1204_s0, 1024 }
  0x1c   : > { %s585_s7 = scalar_lea.hbm %s873_s30, 512  ;;  %p591_p0 = scmp.lt.u32.totalorder %s873_s30, %s1204_s0 }
  0x1d   : > { %p586_p10 = scmp.ne.s32.totalorder %s873_s30, %s585_s7  ;;  %p592_p2 = scmp.lt.u32.totalorder %s590_s26, %s585_s7 }
  0x1e   : > { %p594_p5 = scmp.lt.u32.totalorder %s585_s7, %s873_s30 }
  0x1f   : > { %p588_p12 = pnand %p587_p11, %p586_p10  ;;  %p593_p4 = por %p592_p2, %p591_p0 }
  0x21   : > { %p589_p13 = pneg %p588_p12  ;;  %p595_p1 = por %p594_p5, %p593_p4 }
  0x23   : > { %p596_p8 = pnand %p595_p1, %p589_p13 }
  0x25   : > { %599 = shalt.err (!%p596_p8)
}
  0x26   : > { %s600_s25 = scalar_lea.vmem %s875_s4, 512  ;;  %s773_s29 = smov [#allocation2]  }
  0x27   : > { %p601_p10 = scmp.ne.s32.totalorder %s875_s4, %s600_s25  ;;  %s605_s3 = sshll.u32 %s773_s29, 4  ;;  %s606_s3 = int_to_ptr.vmem [resolvable:$false] %s605_s3 }
  0x28   : > { %s607_s8 = scalar_lea.vmem %s606_s3, 1024  ;;  %p608_p6 = scmp.lt.s32.totalorder %s875_s4, %s606_s3 }
  0x29   : > { %p603_p12 = pnand %p601_p10, %p587_p11  ;;  %p609_p0 = scmp.lt.s32.totalorder %s607_s8, %s600_s25 }
  0x2b   : > { %p604_p9 = pneg %p603_p12  ;;  %p610_p2 = por %p609_p0, %p608_p6 }
  0x2d   : > { %p611_p5 = pnand %p610_p2, %p604_p9 }
  0x2f   : > { %614 = shalt.err (!%p611_p5)
}
  0x30   : > { %485 = dma.hbm_to_vmem [thread:$0]  (!%p879_p7), %s873_s30, 512, %s875_s4, %s134_s6  }
  0x31   : > { %p1206_p1 = scmp.lt.s32.totalorder %s771_s19, 5  ;;  %p1207_p6 = scmp.ge.s32.totalorder %s771_s19, 1 }
  0x32   : > { %s455_s7 = sadd.s32 4294967294, %s771_s19   ;;  %s30_s12 = sadd.s32 1, %s763_s17 }
  0x33   : > { %p914_p8 = pnand %p1207_p6, %p1206_p1  ;;  %p31_p9 = scmp.ge.s32.totalorder %s30_s12, 2 }
  0x34   : > { %s68_s26 = sadd.s32 1, %s739_s11  ;;  %p75_p11 = scmp.ne.s32.totalorder %s739_s11, %s735_s10 }
  0x35   : > { %p81_p13 = scmp.ne.s32.totalorder %s735_s10, %s731_s9  ;;  %s1250_s12 = smov (%p31_p9, %s30_s12), 0 }
  0x36   : > { %1209 = sst [smem:[#allocation13_spill]] %s1250_s12  ;;  %s1252_s21 = smov (!%p31_p9, %s33_s21), %s767_s18 }
  0x37   : > { %s63_s30 = ssub.s32 %s763_s17, %s1250_s12  ;;  %p1210_p7 = scmp.eq.s32.totalorder %s771_s19, 0 }
  0x38   : > { %p35_p10 = scmp.ge.s32.totalorder %s1252_s21, 2  ;;  %p940_p12 = por %p81_p13, %p855_p3 }
  0x39   : > { %p934_p4 = por %p75_p11, %p1210_p7  ;;  %p107_p0 = scmp.eq.s32.totalorder %s454_s20, 3 }
  0x3a   : > { %s1212_s6 = scalar_select %p940_p12, 1, 0 }
  0x3b   : > { %p113_p2 = scmp.eq.s32.totalorder %s455_s7, 3  ;;  %s1254_s21 = smov (%p35_p10, %s1252_s21), 0 }
  0x3c   : > { %1213 = sst [smem:[#allocation14_spill]] %s1254_s21  ;;  %p948_p5 = por %p107_p0, %p75_p11 }
  0x3d   : > { %p952_p1 = por %p113_p2, %p81_p13  ;;  %s37_s23 = ssub.s32 %s767_s18, %s1254_s21 }
  0x3e   : > { %s1214_s27 = scalar_select %p948_p5, 1, 0 }
  0x3f   : > { %s1216_s28 = scalar_select %p952_p1, 1, 0 }
  0x40   : > { %1215 = sst [smem:[#allocation15_spill]] %s1214_s27  ;;  %s152_s25 = sand.u32 1, %s739_s11  }
  0x41   : > { %1217 = sst [smem:[#allocation16_spill]] %s1216_s28  ;;  %p38_p3 = scmp.eq.s32.totalorder %s37_s23, 0 }
  0x42   : > { %s65_s29 = sor.u32 %s63_s30, %s37_s23  ;;  %s461_s8 = sshll.u32 %s152_s25, 5 }
  0x43   : > { %p66_p6 = scmp.eq.s32.totalorder %s65_s29, 0  ;;  %s462_s7 = sshll.u32 %s767_s18, 2 }
  0x44   : > { %s962_s20 = scalar_select %p38_p3, %s751_s14, %s40_s22  }
  0x45   : > { %s965_s3 = scalar_select %p66_p6, %s739_s11, %s68_s26  }
  0x46   : > { %s463_s0 = sshll.u32 %s763_s17, 3  ;;  %s156_s9 = scalar_lea.vmem [#allocation5], %s461_s8 }
  0x47   : > { %s162_s12 = sadd.s32 %s463_s0, %s462_s7  ;;  %s166_s2 = sshll.u32 %s156_s9, 4  ;;  %s969_s2 = int_to_ptr.vmem [resolvable:$true] %s166_s2 }
  0x48   : > { %s464_s27 = sshll.u32 %s162_s12, 7  ;;  %p1218_p9 = scmp.lt.s32.totalorder %s771_s19, 4 }
  0x49   : > { %s974_s15 = scalar_lea.hbm %s1184_s1, %s464_s27  ;;  %s153_s0 = scalar_lea.sflag [#allocation6], %s152_s25 }
  0x4a   : > { %p980_p11 = pnand %p1218_p9, %p934_p4  ;;  %s615_s9 = scalar_lea.hbm %s974_s15, 512 }
  0x4b   : > { %p616_p13 = scmp.ne.s32.totalorder %s974_s15, %s615_s9  ;;  %s620_s26 = scalar_lea.hbm %s1184_s1, 2048 }
  0x4c   : > { %p617_p7 = pneg %p980_p11  ;;  %p621_p4 = scmp.lt.u32.totalorder %s974_s15, %s1184_s1 }
  0x4d   : > { %p622_p2 = scmp.lt.u32.totalorder %s620_s26, %s615_s9  ;;  %p624_p6 = scmp.lt.u32.totalorder %s615_s9, %s974_s15 }
  0x4e   : > { %p618_p10 = pnand %p617_p7, %p616_p13 }
  0x4f   : > { %p623_p3 = por %p622_p2, %p621_p4 }
  0x50   : > { %p619_p0 = pneg %p618_p10 }
  0x51   : > { %p625_p9 = por %p624_p6, %p623_p3 }
  0x53   : > { %p626_p1 = pnand %p625_p9, %p619_p0 }
  0x55   : > { %629 = shalt.err (!%p626_p1)
}
  0x56   : > { %s630_s27 = scalar_lea.vmem %s969_s2, 512  ;;  %s774_s28 = smov [#allocation5]  }
  0x57   : > { %p631_p13 = scmp.ne.s32.totalorder %s969_s2, %s630_s27  ;;  %s635_s23 = sshll.u32 %s774_s28, 4  ;;  %s636_s23 = int_to_ptr.vmem [resolvable:$false] %s635_s23 }
  0x58   : > { %s637_s25 = scalar_lea.vmem %s636_s23, 1024  ;;  %p638_p12 = scmp.lt.s32.totalorder %s969_s2, %s636_s23 }
  0x59   : > { %p633_p10 = pnand %p631_p13, %p617_p7  ;;  %p639_p4 = scmp.lt.s32.totalorder %s637_s25, %s630_s27 }
  0x5b   : > { %p634_p5 = pneg %p633_p10  ;;  %p640_p2 = por %p639_p4, %p638_p12 }
  0x5d   : > { %p641_p3 = pnand %p640_p2, %p634_p5 }
  0x5f   : > { %644 = shalt.err (!%p641_p3)
}
  0x60   : > { %488 = dma.hbm_to_vmem [thread:$0]  (!%p980_p11), %s974_s15, 512, %s969_s2, %s153_s0  }
  0x61   : > { %175 = sbr.rel (%p914_p8) target bundleno = 275 (0x113), region = 28  ;;  %s177_s29 = sand.u32 (!%p914_p8), 1, %s747_s13  }
  0x62   : > { %s466_s8 = sshll.u32 (!%p914_p8), %s177_s29, 5  ;;  %s178_s7 = scalar_lea.sflag (!%p914_p8), [#allocation3], %s177_s29 }
  0x63   : > { %s181_s9 = scalar_lea.vmem (!%p914_p8), [#allocation2], %s466_s8  ;;  %p1220_p1 = scmp.ne.s32.totalorder (!%p914_p8), %s1203_s24, 0 }
  0x68   : > { %718 = dma.done.wait (%p1220_p1), %s178_s7, 512  }
  0x69   : > { %720 = vsyncadd (%p1220_p1), %s178_s7, 4294966784  ;;  %s1017_s22 = sand.u32 1, %s735_s10   ;;  %p1221_p8 = scmp.ne.s32.totalorder %s1212_s6, 0 }
  0x6a   : > { %s467_s2 = sshll.u32 %s1017_s22, 5  ;;  %s187_s15 = scalar_lea.sflag [#allocation6], %s1017_s22 }
  0x6b   : > { %s190_s5 = scalar_lea.vmem [#allocation5], %s467_s2 }
  0x6c   : > { %722 = dma.done.wait (%p1221_p8), %s187_s15, 512  }
  0x6d   : > { %724 = vsyncadd (%p1221_p8), %s187_s15, 4294966784  ;;  %v1027_v0 = vld [vmem:[%s190_s5 + $0x10] sm:$0xff]  ;;  %v1029_v1 = vld [vmem:[%s190_s5] sm:$0xff]  ;;  %s775_s24 = smov 127   ;;  %s776_s0 = smov 1   ;;  %v232_v12 = vlaneseq }
  0x6e   : > { %228 = vrot.lane.b32.xlu1 %v1027_v0, %s775_s24  ;;  %224 = vrot.lane.b32.xlu0 %v1029_v1, %s775_s24  ;;  %v1033_v2 = vld [vmem:[%s190_s5 + $0x18] sm:$0xff]  ;;  %v1035_v3 = vld [vmem:[%s190_s5 + $0x8] sm:$0xff]  ;;  %s1230_s6 = sld [smem:[#allocation12_spill]]  ;;  %s470_s21 = sshll.u32 %s759_s16, 2 }
  0x6f   : > { %v221_v4 = vld [vmem:[%s181_s9 + $0x8] sm:$0xff]  ;;  %v220_v5 = vld [vmem:[%s181_s9] sm:$0xff]  ;;  %v1043_v6 = vld [vmem:[%s181_s9 + $0x18] sm:$0xff]  ;;  %v233_v15 = vand.u32 127, %v232_v12  ;;  %s215_s26 = scalar_lea.vmem [#allocation7], %s467_s2  ;;  %s1231_s27 = sld [smem:[#allocation15_spill]] }
  0x70   : > { %v222_v7 = vld [vmem:[%s181_s9 + $0x10] sm:$0xff]  ;;  %v296_v37 = vmul.f32 %v221_v4, %v1035_v3  ;;  %v295_v50 = vmul.f32 %v220_v5, %v1029_v1  ;;  %v298_v51 = vmul.f32 %v1043_v6, %v1033_v2  ;;  %s344_s4 = sshll.u32 %s215_s26, 4  ;;  %s1232_s25 = sld [smem:[#allocation18_spill]]  ;;  %s1118_s4 = int_to_ptr.vmem [resolvable:$true] %s344_s4 }
  0x71   : > { %v276_v18 = vadd.s32 128, %v233_v15  ;;  %v277_v19 = vadd.s32 256, %v233_v15  ;;  %v278_v20 = vadd.s32 384, %v233_v15  ;;  %v279_v24 = vand.u32 1, %v233_v15  ;;  %s328_s8 = scalar_lea.sflag [#allocation4], %s1017_s22  ;;  %s645_s7 = scalar_lea.vmem %s1118_s4, 512 }
  0x72   : > { %230 = vrot.lane.b32.xlu1 %v1033_v2, %s775_s24  ;;  %226 = vrot.lane.b32.xlu0 %v1035_v3, %s775_s24  ;;  %vm247_vm0 = vcmp.lt.s32.totalorder %v233_v15, 1  ;;  %vm234_vm1 = vcmp.lt.s32.totalorder %v233_v15, 127  ;;  %v297_v52 = vmul.f32 %v222_v7, %v1027_v0  ;;  %p646_p12 = scmp.ne.s32.totalorder %s1118_s4, %s645_s7  ;;  %s777_s9 = smov [#allocation7]  }
  0x73   : > { %v280_v23 = vand.u32 1, %v276_v18  ;;  %v281_v25 = vand.u32 1, %v277_v19  ;;  %v282_v26 = vand.u32 1, %v278_v20  ;;  %vm1052_vm3 = vcmp.eq.s32.totalorder %v279_v24, 0  ;;  %s649_s2 = sshll.u32 %s777_s9, 4  ;;  %s650_s2 = int_to_ptr.vmem [resolvable:$false] %s649_s2 }
  0x74   : > { %s471_s12 = sshll.u32 %s1230_s6, 3  ;;  %s651_s15 = scalar_lea.vmem %s650_s2, 1024 }
  0x75   : > { %vm1047_vm2 = vcmp.eq.s32.totalorder %v280_v23, 0  ;;  %vm1057_vm4 = vcmp.eq.s32.totalorder %v281_v25, 0  ;;  %vm1061_vm5 = vcmp.eq.s32.totalorder %v282_v26, 0  ;;  %s340_s16 = sadd.s32 %s471_s12, %s470_s21  ;;  %p1233_p5 = scmp.ne.s32.totalorder %s1231_s27, 0 }
  0x76   : > { %241 = vrot.lane.b32.xlu1 %v1035_v3, %s776_s0  ;;  %239 = vrot.lane.b32.xlu0 %v1029_v1, %s776_s0  ;;  %s472_s30 = sshll.u32 %s340_s16, 7  ;;  %p652_p0 = scmp.lt.s32.totalorder %s1118_s4, %s650_s2 }
  0x77   : > { %s1116_s29 = scalar_lea.hbm %s1232_s25, %s472_s30  ;;  %p647_p11 = pnand %p646_p12, %p1233_p5 }
  0x78   : > { %p653_p6 = scmp.lt.s32.totalorder %s651_s15, %s645_s7 }
  0x79   : > { %p648_p7 = pneg %p647_p11 }
  0x7a   : > { %245 = vrot.lane.b32.xlu1 %v1033_v2, %s776_s0  ;;  %243 = vrot.lane.b32.xlu0 %v1027_v0, %s776_s0  ;;  %p654_p9 = por %p653_p6, %p652_p0 }
  0x7c   : > { %p655_p13 = pnand %p654_p9, %p648_p7 }
  0x7e   : > { %254 = vrot.lane.b32.xlu1 %v221_v4, %s775_s24  ;;  %252 = vrot.lane.b32.xlu0 %v220_v5, %s775_s24 }
  0x82   : > { %258 = vrot.lane.b32.xlu1 %v1043_v6, %s775_s24  ;;  %256 = vrot.lane.b32.xlu0 %v222_v7, %s775_s24 }
  0x86   : > { %266 = vrot.lane.b32.xlu1 %v221_v4, %s776_s0  ;;  %264 = vrot.lane.b32.xlu0 %v220_v5, %s776_s0 }
  0x8a   : > { %270 = vrot.lane.b32.xlu1 %v1043_v6, %s776_s0  ;;  %268 = vrot.lane.b32.xlu0 %v222_v7, %s776_s0 }
  0xe0   : > { %v229_v8 = vpop.permute.xlu1 %228  ;;  %v225_v9 = vpop.permute.xlu0 %224 }
  0xe4   : > { %v231_v10 = vpop.permute.xlu1 %230  ;;  %v227_v11 = vpop.permute.xlu0 %226 }
  0xe5   : > { %v236_v38 = vsel %vm234_vm1, %v227_v11, %v229_v8  ;;  %v237_v39 = vsel %vm234_vm1, %v225_v9, %v227_v11  ;;  %v235_v40 = vsel %vm234_vm1, %v229_v8, %v231_v10  ;;  %v238_v41 = vsel %vm234_vm1, %v231_v10, %v225_v9 }
  0xe8   : > { %v242_v13 = vpop.permute.xlu1 %241  ;;  %v240_v14 = vpop.permute.xlu0 %239 }
  0xe9   : > { %v250_v30 = vsel %vm247_vm0, %v240_v14, %v242_v13 }
  0xea   : > { %v288_v42 = vsel %vm1047_vm2, %v236_v38, %v250_v30 }
  0xeb   : > { %v312_v54 = vmul.f32 %v288_v42, %v221_v4 }
  0xec   : > { %v246_v16 = vpop.permute.xlu1 %245  ;;  %v244_v17 = vpop.permute.xlu0 %243 }
  0xed   : > { %v251_v32 = vsel %vm247_vm0, %v246_v16, %v240_v14  ;;  %v248_v35 = vsel %vm247_vm0, %v244_v17, %v246_v16  ;;  %v249_v36 = vsel %vm247_vm0, %v242_v13, %v244_v17 }
  0xee   : > { %v287_v43 = vsel %vm1052_vm3, %v237_v39, %v251_v32  ;;  %v289_v46 = vsel %vm1057_vm4, %v235_v40, %v249_v36  ;;  %v290_v47 = vsel %vm1061_vm5, %v238_v41, %v248_v35 }
  0xef   : > { %v311_v55 = vmul.f32 %v287_v43, %v220_v5  ;;  %v313_v58 = vmul.f32 %v289_v46, %v222_v7  ;;  %v314_v59 = vmul.f32 %v290_v47, %v1043_v6 }
  0xf0   : > { %v255_v21 = vpop.permute.xlu1 %254  ;;  %v253_v22 = vpop.permute.xlu0 %252 }
  0xf1   : > { %v262_v60 = vsel %vm234_vm1, %v253_v22, %v255_v21 }
  0xf4   : > { %v259_v27 = vpop.permute.xlu1 %258  ;;  %v257_v28 = vpop.permute.xlu0 %256 }
  0xf5   : > { %v261_v48 = vsel %vm234_vm1, %v255_v21, %v257_v28  ;;  %v263_v61 = vsel %vm234_vm1, %v259_v27, %v253_v22  ;;  %v260_v5 = vsel %vm234_vm1, %v257_v28, %v259_v27 }
  0xf8   : > { %v267_v44 = vpop.permute.xlu1 %266  ;;  %v265_v45 = vpop.permute.xlu0 %264 }
  0xf9   : > { %v274_v49 = vsel %vm247_vm0, %v265_v45, %v267_v44 }
  0xfa   : > { %v292_v53 = vsel %vm1047_vm2, %v261_v48, %v274_v49 }
  0xfb   : > { %v300_v56 = vmul.f32 %v292_v53, %v288_v42  ;;  %v308_v57 = vmul.f32 %v292_v53, %v1035_v3 }
  0xfc   : > { %v271_v62 = vpop.permute.xlu1 %270  ;;  %v269_v63 = vpop.permute.xlu0 %268 }
  0xfd   : > { %v304_v8 = vsub.f32 %v296_v37, %v300_v56  ;;  %v316_v9 = vadd.f32 %v312_v54, %v308_v57  ;;  %v275_v10 = vsel %vm247_vm0, %v271_v62, %v265_v45  ;;  %v272_v4 = vsel %vm247_vm0, %v269_v63, %v271_v62 }
  0xfe   : > { %v291_v3 = vsel %vm1052_vm3, %v262_v60, %v275_v10  ;;  %v273_v6 = vsel %vm247_vm0, %v267_v44, %v269_v63  ;;  %v294_v7 = vsel %vm1061_vm5, %v263_v61, %v272_v4 }
  0xff   : > { %v320_v11 = vsel %vm1047_vm2, %v304_v8, %v316_v9  ;;  %v299_v12 = vmul.f32 %v291_v3, %v287_v43  ;;  %v307_v13 = vmul.f32 %v291_v3, %v1029_v1  ;;  %v293_v14 = vsel %vm1057_vm4, %v260_v5, %v273_v6 }
 0x100   : > { %324 = vst [vmem:[%s215_s26 + $0x8] sm:$0xff] %v320_v11  ;;  %v301_v16 = vmul.f32 %v293_v14, %v289_v46  ;;  %v302_v17 = vmul.f32 %v294_v7, %v290_v47  ;;  %v309_v15 = vmul.f32 %v293_v14, %v1027_v0  ;;  %v310_v18 = vmul.f32 %v294_v7, %v1033_v2 }
 0x101   : > { %v303_v19 = vsub.f32 %v295_v50, %v299_v12  ;;  %v315_v20 = vadd.f32 %v311_v55, %v307_v13 }
 0x102   : > { %v305_v21 = vsub.f32 %v297_v52, %v301_v16  ;;  %v306_v1 = vsub.f32 %v298_v51, %v302_v17  ;;  %v317_v22 = vadd.f32 %v313_v58, %v309_v15  ;;  %v318_v23 = vadd.f32 %v314_v59, %v310_v18 }
 0x103   : > { %v319_v24 = vsel %vm1052_vm3, %v303_v19, %v315_v20 }
 0x104   : > { %323 = vst [vmem:[%s215_s26] sm:$0xff] %v319_v24  ;;  %v321_v0 = vsel %vm1057_vm4, %v305_v21, %v317_v22  ;;  %v322_v2 = vsel %vm1061_vm5, %v306_v1, %v318_v23 }
 0x105   : > { %325 = vst [vmem:[%s215_s26 + $0x10] sm:$0xff] %v321_v0  ;;  %326 = vst [vmem:[%s215_s26 + $0x18] sm:$0xff] %v322_v2 }
 0x106   : > { %658 = shalt.err (!%p655_p13)
}
 0x107   : > { %s659_s22 = scalar_lea.hbm %s1116_s29, 512  ;;  %s663_s0 = scalar_lea.hbm %s1232_s25, 2048 }
 0x108   : > { %p660_p10 = scmp.ne.s32.totalorder %s1116_s29, %s659_s22  ;;  %p664_p3 = scmp.lt.u32.totalorder %s1116_s29, %s1232_s25 }
 0x109   : > { %p665_p1 = scmp.lt.u32.totalorder %s663_s0, %s659_s22  ;;  %p667_p12 = scmp.lt.u32.totalorder %s659_s22, %s1116_s29 }
 0x10a   : > { %p661_p4 = pnand %p660_p10, %p1233_p5 }
 0x10b   : > { %p666_p8 = por %p665_p1, %p664_p3 }
 0x10c   : > { %p662_p2 = pneg %p661_p4 }
 0x10d   : > { %p668_p11 = por %p667_p12, %p666_p8 }
 0x10f   : > { %p669_p7 = pnand %p668_p11, %p662_p2 }
 0x111   : > { %672 = shalt.err (!%p669_p7)
}
 0x112   : > { %480 = dma.vmem_to_hbm [thread:$0]  (%p1233_p5), %s1118_s4, 512, %s1116_s29, %s328_s8  }
 0x113 PF: > { %s1234_s12 = sld [smem:[#allocation11_spill]]  ;;  %s1235_s16 = sld [smem:[#allocation16_spill]] }
 0x114   : > { %p494_p0 = scmp.ge.s32.totalorder %s771_s19, 2 }
 0x119   : > { %s356_s26 = sand.u32 1, %s1234_s12   ;;  %p1236_p6 = scmp.ne.s32.totalorder %s1235_s16, 0 }
 0x11a   : > { %s357_s30 = scalar_lea.sflag [#allocation4], %s356_s26 }
 0x11b   : > { %p490_p9 = pnand %p494_p0, %p1236_p6 }
 0x11d   : > { %726 = dma.done.wait (!%p490_p9), %s357_s30, 512  }
 0x11e   : > { %728 = vsyncadd (!%p490_p9), %s357_s30, 4294966784  ;;  %s21_s19 = sadd.s32 1, %s771_s19   ;;  %s1237_s4 = sld [smem:[#allocation13_spill]] }
 0x11f   : > { %p18_p13 = scmp.ge.s32.totalorder %s21_s19, 6   ;;  %s1238_s27 = sld [smem:[#allocation14_spill]] }
 0x120   : > { %s1239_s9 = smov %s735_s10  ;;  %s1240_s10 = smov %s739_s11 }
 0x121   : > { %s1241_s11 = smov %s965_s3  ;;  %s1242_s12 = smov %s747_s13 }
 0x122   : > { %s1243_s13 = smov %s751_s14  ;;  %s1244_s14 = smov %s962_s20 }
 0x123   : > { %s1245_s15 = smov %s763_s17  ;;  %s1246_s16 = smov %s767_s18 }
 0x124   : > { %s1247_s17 = smov %s1237_s4  ;;  %20 = sbr.rel (!%p18_p13) target bundleno = 14 (0xe), region = 86 }
 0x125   : > { %s1248_s18 = smov %s1238_s27 }
 0x12b   :  { %362 = vsyncpa [#allocation3], 1 }
 0x12c   :  { %364 = vsyncpa [#allocation3 + $0x1], 1 }
 0x12d   :  { %365 = vsyncpa [#allocation6], 1 }
 0x12e   :  { %367 = vsyncpa [#allocation6 + $0x1], 1 }
 0x12f   :  { %368 = vsyncpa [#allocation4], 1 }
 0x130   :  { %370 = vsyncpa [#allocation4 + $0x1], 1 }

</bundles_post_ra>
